<compile_context>
chip_gen: v6e
topology: v6e:2x2x1
jax: 0.10.0
libtpu: 0.0.40
codegen_flags: <defaults>
</compile_context>

<pallas_src>
import functools

import jax
import jax.numpy as jnp
from jax.experimental import pallas as pl
from jax.experimental.pallas import tpu as pltpu


def _l1_partial_kernel(real_ref, fake_ref, out_ref):
    """Accumulate sum(|fake - real|) folded down to a (1, 8, lanes) block."""
    i = pl.program_id(1)

    @pl.when(i == 0)
    def _():
        out_ref[...] = jnp.zeros_like(out_ref)

    diff = jnp.abs(
        fake_ref[...].astype(jnp.float32) - real_ref[...].astype(jnp.float32)
    )
    tr, ln = diff.shape
    # Fold (tile_rows, lanes) -> (1, 8, lanes) via pure VPU adds: sublane
    # groups of 8 rows keep their natural vreg layout, no cross-lane work.
    out_ref[...] += diff.reshape(tr // 8, 1, 8, ln).sum(axis=0)


def mel_loss(melspec_real, melspec_fake, *, lanes=1024,
             target_tile_bytes=2 << 20, num_slices=2):
    """Mean absolute error, matching F.l1_loss(melspec_fake, melspec_real)."""
    assert melspec_real.shape == melspec_fake.shape
    n_total = melspec_real.size

    real_flat = melspec_real.reshape(-1)
    fake_flat = melspec_fake.reshape(-1)

    # Tile rows sized from the VMEM budget (multiple of 8), clamped so tiny
    # inputs are not grossly over-padded.
    tile_rows = max(8, (target_tile_bytes // (lanes * 4)) // 8 * 8)
    rows_needed = pl.cdiv(n_total, lanes)
    rows_per_slice = pl.cdiv(rows_needed, num_slices)
    tile_rows = min(tile_rows, pl.cdiv(rows_per_slice, 8) * 8)

    chunk = num_slices * tile_rows
    padded_rows = pl.cdiv(rows_needed, chunk) * chunk
    pad = padded_rows * lanes - n_total
    if pad:
        real_flat = jnp.pad(real_flat, (0, pad))
        fake_flat = jnp.pad(fake_flat, (0, pad))

    real2d = real_flat.reshape(padded_rows, lanes)
    fake2d = fake_flat.reshape(padded_rows, lanes)

    inner_steps = padded_rows // chunk
    row_map = lambda s, i: (s * inner_steps + i, 0)

    # 2 inputs x 2 pipeline buffers x tile bytes, plus small output blocks.
    vmem_need = 2 * 2 * tile_rows * lanes * 4 + 2 * 2 * 8 * lanes * 4
    vmem_limit = int(max(vmem_need + (8 << 20), 32 << 20))

    partials = pl.pallas_call(
        _l1_partial_kernel,
        out_shape=jax.ShapeDtypeStruct((num_slices, 8, lanes), jnp.float32),
        grid_spec=pltpu.PrefetchScalarGridSpec(
            num_scalar_prefetch=0,
            grid=(num_slices, inner_steps),
            in_specs=[
                pl.BlockSpec((tile_rows, lanes), row_map),
                pl.BlockSpec((tile_rows, lanes), row_map),
            ],
            out_specs=pl.BlockSpec((1, 8, lanes), lambda s, i: (s, 0, 0)),
        ),
        compiler_params=pltpu.CompilerParams(
            dimension_semantics=("parallel", "arbitrary"),
            vmem_limit_bytes=vmem_limit,
        ),
    )(real2d, fake2d)

    # Single tiny final reduction + division by the unpadded element count.
    return jnp.sum(partials) / jnp.float32(n_total)


if __name__ == "__main__":
    key = jax.random.PRNGKey(0)
    k1, k2 = jax.random.split(key)

    # Small mel-spectrogram-like shape: (batch=2, n_mels=16, time=128).
    B, n_mels, T = 2, 16, 128
    melspec_real = jax.random.normal(k1, (B, n_mels, T), dtype=jnp.float32)
    melspec_fake = jax.random.normal(k2, (B, n_mels, T), dtype=jnp.float32)

    loss = mel_loss(melspec_real, melspec_fake)
    jax.block_until_ready(loss)

    ref = jnp.mean(jnp.abs(melspec_fake - melspec_real))
    assert jnp.allclose(loss, ref, rtol=1e-5, atol=1e-6), (loss, ref)

    # Ragged time dim (not a multiple of 128) exercises the padding path.
    k3, k4 = jax.random.split(k2)
    melspec_real2 = jax.random.normal(k3, (2, 80, 173), dtype=jnp.float32)
    melspec_fake2 = jax.random.normal(k4, (2, 80, 173), dtype=jnp.float32)
    loss2 = mel_loss(melspec_real2, melspec_fake2)
    jax.block_until_ready(loss2)
    ref2 = jnp.mean(jnp.abs(melspec_fake2 - melspec_real2))
    assert jnp.allclose(loss2, ref2, rtol=1e-5, atol=1e-6), (loss2, ref2)

    print("KERNEL_OK")
</pallas_src>

<mosaic_0001>
module attributes {stable_mosaic.version = 11 : i64} {
  func.func @_l1_partial_kernel(%arg0: i32, %arg1: i32, %arg2: memref<8x1024xf32, #tpu.memory_space<vmem>>, %arg3: memref<8x1024xf32, #tpu.memory_space<vmem>>, %arg4: memref<1x8x1024xf32, #tpu.memory_space<vmem>>) attributes {dimension_semantics = [#tpu.dimension_semantics<parallel>, #tpu.dimension_semantics<arbitrary>], iteration_bounds = array<i64: 2, 1>, scalar_prefetch = 0 : i64, scratch_operands = 0 : i64, tpu.core_type = #tpu.core_type<tc>, window_params = [{transform_indices = @transform_0, window_bounds = array<i64: 8, 1024>}, {transform_indices = @transform_1, window_bounds = array<i64: 8, 1024>}, {transform_indices = @transform_2, window_bounds = array<i64: 1, 8, 1024>}]} {
    %c0_i32 = arith.constant 0 : i32
    %0 = arith.cmpi eq, %arg1, %c0_i32 : i32
    %1 = arith.extui %0 : i1 to i32
    %c0_i32_0 = arith.constant 0 : i32
    %2 = arith.cmpi ne, %1, %c0_i32_0 : i32
    scf.if %2 {
      %cst_10 = arith.constant 0.000000e+00 : f32
      %12 = vector.broadcast %cst_10 : f32 to vector<1x8x1024xf32>
      %c0_11 = arith.constant 0 : index
      %c0_12 = arith.constant 0 : index
      %c0_13 = arith.constant 0 : index
      %13 = vector.load %arg4[%c0_11, %c0_12, %c0_13] : memref<1x8x1024xf32, #tpu.memory_space<vmem>>, vector<1x8x1024xf32>
      tpu.vector_store %arg4[%c0_11, %c0_12, %c0_13], %12 {strides = array<i32>} : memref<1x8x1024xf32, #tpu.memory_space<vmem>>, vector<1x8x1024xf32>,
    } else {
    }
    %c0 = arith.constant 0 : index
    %c0_1 = arith.constant 0 : index
    %3 = vector.load %arg3[%c0, %c0_1] : memref<8x1024xf32, #tpu.memory_space<vmem>>, vector<8x1024xf32>
    %c0_2 = arith.constant 0 : index
    %c0_3 = arith.constant 0 : index
    %4 = vector.load %arg2[%c0_2, %c0_3] : memref<8x1024xf32, #tpu.memory_space<vmem>>, vector<8x1024xf32>
    %5 = arith.subf %3, %4 : vector<8x1024xf32>
    %6 = math.absf %5 : vector<8x1024xf32>
    %c0_4 = arith.constant 0 : index
    %c0_5 = arith.constant 0 : index
    %c0_6 = arith.constant 0 : index
    %7 = vector.load %arg4[%c0_4, %c0_5, %c0_6] : memref<1x8x1024xf32, #tpu.memory_space<vmem>>, vector<1x8x1024xf32>
    %8 = vector.shape_cast %6 : vector<8x1024xf32> to vector<1x1x8x1024xf32>
    %cst = arith.constant dense<0.000000e+00> : vector<1x8x1024xf32>
    %9 = vector.multi_reduction <add>, %8, %cst [0] : vector<1x1x8x1024xf32> to vector<1x8x1024xf32>
    %10 = arith.addf %7, %9 : vector<1x8x1024xf32>
    %c0_7 = arith.constant 0 : index
    %c0_8 = arith.constant 0 : index
    %c0_9 = arith.constant 0 : index
    %11 = vector.load %arg4[%c0_7, %c0_8, %c0_9] : memref<1x8x1024xf32, #tpu.memory_space<vmem>>, vector<1x8x1024xf32>
    tpu.vector_store %arg4[%c0_7, %c0_8, %c0_9], %10 {strides = array<i32>} : memref<1x8x1024xf32, #tpu.memory_space<vmem>>, vector<1x8x1024xf32>,
    return
  }
  func.func @transform_0(%arg0: i32, %arg1: i32) -> (i32, i32) {
    %c1_i32 = arith.constant 1 : i32
    %0 = arith.muli %arg0, %c1_i32 : i32
    %1 = arith.addi %0, %arg1 : i32
    %c0_i32 = arith.constant 0 : i32
    %c0_i32_0 = arith.constant 0 : i32
    return %1, %c0_i32 : i32, i32
  }
  func.func @transform_1(%arg0: i32, %arg1: i32) -> (i32, i32) {
    %c1_i32 = arith.constant 1 : i32
    %0 = arith.muli %arg0, %c1_i32 : i32
    %1 = arith.addi %0, %arg1 : i32
    %c0_i32 = arith.constant 0 : i32
    %c0_i32_0 = arith.constant 0 : i32
    return %1, %c0_i32 : i32, i32
  }
  func.func @transform_2(%arg0: i32, %arg1: i32) -> (i32, i32, i32) {
    %c0_i32 = arith.constant 0 : i32
    %c0_i32_0 = arith.constant 0 : i32
    %c0_i32_1 = arith.constant 0 : i32
    return %arg0, %c0_i32, %c0_i32_0 : i32, i32, i32
  }
}

</mosaic_0001>

<bundles_post_ra>
// kernel: tpu_custom_call.1
= control target key start
LH: loop header
LB: loop body
LE: loop exit
PB: predicated region body
PF: predicated region fallthrough
CT: control target
= control target key end

     0   :  { %7 = vsyncpa [#allocation3], 0  ;;  %s838_s0 = inlined_call_operand.hbm [shape: f32[16,1024], index: 0, kind: input, shape index: {}]   ;;  %s839_s1 = inlined_call_operand.hbm [shape: f32[16,1024], index: 1, kind: input, shape index: {}]   ;;  %s840_s2 = inlined_call_operand.hbm [shape: f32[2,8,1024], index: 2, kind: output, shape index: {}]  }
   0x1   :  { %9 = vsyncpa [#allocation3 + $0x1], 0 }
   0x2   :  { %10 = vsyncpa [#allocation6], 0 }
   0x3   :  { %12 = vsyncpa [#allocation6 + $0x1], 0 }
   0x4   :  { %13 = vsyncpa [#allocation4], 0 }
   0x5   :  { %15 = vsyncpa [#allocation4 + $0x1], 0  ;;  %s662_s9 = smov 0   ;;  %s664_s10 = smov 0  }
   0x6   :  { %s666_s11 = smov 0   ;;  %s668_s12 = smov 0  }
   0x7   :  { %s670_s13 = smov 0   ;;  %s672_s14 = smov 0  }
   0x8 LB: > { %s412_s15 = sadd.s32 4294967295, %s642_s14   ;;  %s413_s16 = sadd.s32 4294967294, %s642_s14   ;;  %s642_s14 = sphi %s672_s14, %s21_s14   ;;  %s638_s13 = sphi %s670_s13, %s852_s13   ;;  %s634_s12 = sphi %s668_s12, %s851_s12   ;;  %s630_s11 = sphi %s666_s11, %s850_s11   ;;  %s626_s10 = sphi %s664_s10, %s849_s10   ;;  %s622_s9 = sphi %s662_s9, %s848_s9  }
   0x9   : > { %s33_s17 = sadd.s32 1, %s638_s13  ;;  %s42_s18 = sadd.s32 1, %s630_s11 }
   0xa   : > { %p35_p0 = scmp.ge.s32.totalorder %s33_s17, 2  ;;  %p49_p1 = scmp.ne.s32.totalorder %s630_s11, %s626_s10 }
   0xb   : > { %p50_p2 = scmp.eq.s32.totalorder %s642_s14, 0  ;;  %p55_p3 = scmp.ne.s32.totalorder %s626_s10, %s622_s9 }
   0xc   : > { %s854_s17 = smov (%p35_p0, %s33_s17), 0  ;;  %p56_p5 = scmp.eq.s32.totalorder %s412_s15, 0 }
   0xd   : > { %p703_p4 = por %p50_p2, %p49_p1  ;;  %s39_s20 = ssub.s32 %s638_s13, %s854_s17 }
   0xe   : > { %p107_p6 = scmp.eq.s32.totalorder %s412_s15, 1  ;;  %p40_p7 = scmp.eq.s32.totalorder %s39_s20, 0 }
   0xf   : > { %p709_p8 = por %p56_p5, %p55_p3  ;;  %p113_p10 = scmp.eq.s32.totalorder %s413_s16, 1 }
  0x10   : > { %p713_p9 = por %p107_p6, %p49_p1  ;;  %p451_p13 = scmp.lt.s32.totalorder %s642_s14, 2 }
  0x11   : > { %s718_s23 = scalar_select %p40_p7, %s630_s11, %s42_s18  }
  0x12   : > { %p720_p11 = por %p113_p10, %p55_p3  ;;  %s727_s25 = sand.u32 1, %s630_s11  }
  0x13   : > { %s416_s26 = sshll.u32 %s727_s25, 6  ;;  %s431_s27 = sshll.u32 %s638_s13, 10 }
  0x14   : > { %s144_s30 = scalar_lea.hbm %s838_s0, %s431_s27  ;;  %s137_s3 = scalar_lea.vmem [#allocation2], %s416_s26 }
  0x15   : > { %s146_s4 = sshll.u32 %s137_s3, 4  ;;  %p736_p0 = pnand %p451_p13, %p703_p4  ;;  %s147_s4 = int_to_ptr.vmem [resolvable:$true] %s146_s4 }
  0x16   : > { %p422_p1 = scmp.ge.s32.totalorder %s642_s14, 1  ;;  %p171_p2 = scmp.lt.s32.totalorder %s642_s14, 3 }
  0x17   : > { %s134_s6 = scalar_lea.sflag [#allocation3], %s727_s25  ;;  %p504_p3 = pneg %p736_p0 }
  0x18   : > { %s515_s7 = scalar_lea.vmem %s147_s4, 1024  ;;  %s644_s8 = smov [#allocation2]  }
  0x19   : > { %p516_p5 = scmp.ne.s32.totalorder %s147_s4, %s515_s7  ;;  %s520_s15 = sshll.u32 %s644_s8, 4  ;;  %s521_s15 = int_to_ptr.vmem [resolvable:$false] %s520_s15 }
  0x1a   : > { %s522_s16 = scalar_lea.vmem %s521_s15, 2048  ;;  %p523_p4 = scmp.lt.s32.totalorder %s147_s4, %s521_s15 }
  0x1b   : > { %p518_p6 = pnand %p516_p5, %p504_p3  ;;  %p524_p10 = scmp.lt.s32.totalorder %s522_s16, %s515_s7 }
  0x1d   : > { %p519_p7 = pneg %p518_p6  ;;  %p525_p13 = por %p524_p10, %p523_p4 }
  0x1f   : > { %p526_p12 = pnand %p525_p13, %p519_p7 }
  0x21   : > { %529 = shalt.err (!%p526_p12)
}
  0x22   : > { %443 = dma.hbm_to_vmem [thread:$0]  (!%p736_p0), %s144_s30, 1024, %s147_s4, %s134_s6  }
  0x23   : > { %p754_p5 = pnand %p422_p1, %p171_p2  ;;  %s164_s28 = scalar_lea.hbm %s839_s1, %s431_s27 }
  0x24   : > { %s157_s29 = scalar_lea.vmem [#allocation5], %s416_s26  ;;  %s154_s7 = scalar_lea.sflag [#allocation6], %s727_s25 }
  0x25   : > { %s166_s3 = sshll.u32 %s157_s29, 4  ;;  %s645_s30 = smov [#allocation5]   ;;  %s167_s3 = int_to_ptr.vmem [resolvable:$true] %s166_s3 }
  0x26   : > { %s543_s8 = scalar_lea.vmem %s167_s3, 1024  ;;  %s548_s4 = sshll.u32 %s645_s30, 4  ;;  %s549_s4 = int_to_ptr.vmem [resolvable:$false] %s548_s4 }
  0x27   : > { %p544_p12 = scmp.ne.s32.totalorder %s167_s3, %s543_s8  ;;  %s550_s6 = scalar_lea.vmem %s549_s4, 2048 }
  0x28   : > { %p551_p1 = scmp.lt.s32.totalorder %s167_s3, %s549_s4  ;;  %p552_p2 = scmp.lt.s32.totalorder %s550_s6, %s543_s8 }
  0x29   : > { %p546_p6 = pnand %p544_p12, %p504_p3 }
  0x2a   : > { %p553_p4 = por %p552_p2, %p551_p1 }
  0x2b   : > { %p547_p7 = pneg %p546_p6 }
  0x2d   : > { %p554_p10 = pnand %p553_p4, %p547_p7 }
  0x2f   : > { %557 = shalt.err (!%p554_p10)
}
  0x30   : > { %446 = dma.hbm_to_vmem [thread:$0]  (!%p736_p0), %s164_s28, 1024, %s167_s3, %s154_s7  }
  0x31   : > { %175 = sbr.rel (%p754_p5) target bundleno = 83 (0x53), region = 28  ;;  %s770_s25 = sand.u32 (!%p754_p5), 1, %s626_s10  }
  0x32   : > { %s773_s26 = sshll.u32 (!%p754_p5), %s770_s25, 6  ;;  %s178_s27 = scalar_lea.sflag (!%p754_p5), [#allocation3], %s770_s25 }
  0x33   : > { %s777_s15 = scalar_lea.vmem (!%p754_p5), [#allocation2], %s773_s26 }
  0x36   : > { %609 = dma.done.wait (%p709_p8), %s178_s27, 1024  }
  0x37   : > { %611 = vsyncadd (%p709_p8), %s178_s27, 4294966272  ;;  %s187_s5 = scalar_lea.sflag [#allocation6], %s770_s25  ;;  %s190_s16 = scalar_lea.vmem [#allocation5], %s773_s26 }
  0x38   : > { %613 = dma.done.wait (%p709_p8), %s187_s5, 1024  }
  0x39   : > { %615 = vsyncadd (%p709_p8), %s187_s5, 4294966272  ;;  %v230_v0 = vld [vmem:[%s190_s16] sm:$0xff]  ;;  %v231_v2 = vld [vmem:[%s190_s16 + $0x8] sm:$0xff]  ;;  %s215_s21 = scalar_lea.vmem [#allocation7], %s773_s26  ;;  %s433_s18 = sshll.u32 %s634_s12, 10 }
  0x3a   : > { %v238_v1 = vld [vmem:[%s777_s15] sm:$0xff]  ;;  %v239_v4 = vld [vmem:[%s777_s15 + $0x8] sm:$0xff]  ;;  %v232_v5 = vld [vmem:[%s190_s16 + $0x10] sm:$0xff]  ;;  %s309_s19 = sshll.u32 %s215_s21, 4  ;;  %s307_s29 = scalar_lea.hbm %s840_s2, %s433_s18  ;;  %s310_s19 = int_to_ptr.vmem [resolvable:$true] %s309_s19 }
  0x3b   : > { %v246_v3 = vsub.f32 %v230_v0, %v238_v1  ;;  %v240_v6 = vld [vmem:[%s777_s15 + $0x10] sm:$0xff]  ;;  %v247_v7 = vsub.f32 %v231_v2, %v239_v4  ;;  %v233_v9 = vld [vmem:[%s190_s16 + $0x18] sm:$0xff]  ;;  %v234_v11 = vld [vmem:[%s190_s16 + $0x20] sm:$0xff]  ;;  %s295_s3 = scalar_lea.sflag [#allocation4], %s770_s25  ;;  %s558_s7 = scalar_lea.vmem %s310_s19, 1024 }
  0x3c   : > { %v248_v8 = vsub.f32 %v232_v5, %v240_v6  ;;  %v241_v10 = vld [vmem:[%s777_s15 + $0x18] sm:$0xff]  ;;  %v242_v14 = vld [vmem:[%s777_s15 + $0x20] sm:$0xff]  ;;  %v235_v15 = vld [vmem:[%s190_s16 + $0x28] sm:$0xff]  ;;  %p559_p8 = scmp.ne.s32.totalorder %s310_s19, %s558_s7  ;;  %s646_s8 = smov [#allocation7]  }
  0x3d   : > { %v254_v12 = vand.u32 2147483647, %v246_v3  ;;  %v249_v13 = vsub.f32 %v233_v9, %v241_v10  ;;  %v243_v16 = vld [vmem:[%s777_s15 + $0x28] sm:$0xff]  ;;  %v255_v17 = vand.u32 2147483647, %v247_v7  ;;  %v250_v19 = vsub.f32 %v234_v11, %v242_v14  ;;  %v236_v21 = vld [vmem:[%s190_s16 + $0x30] sm:$0xff] }
  0x3e   : > { %v256_v18 = vand.u32 2147483647, %v248_v8  ;;  %v251_v20 = vsub.f32 %v235_v15, %v243_v16  ;;  %v244_v22 = vld [vmem:[%s777_s15 + $0x30] sm:$0xff]  ;;  %v237_v25 = vld [vmem:[%s190_s16 + $0x38] sm:$0xff]  ;;  %p560_p0 = pnand %p559_p8, %p713_p9  ;;  %s562_s12 = sshll.u32 %s646_s8, 4  ;;  %s563_s12 = int_to_ptr.vmem [resolvable:$false] %s562_s12 }
  0x3f   : > { %v257_v23 = vand.u32 2147483647, %v249_v13  ;;  %v252_v24 = vsub.f32 %v236_v21, %v244_v22  ;;  %v245_v26 = vld [vmem:[%s777_s15 + $0x38] sm:$0xff]  ;;  %v258_v27 = vand.u32 2147483647, %v250_v19  ;;  %286 = vst [vmem:[%s215_s21] sm:$0xff] %v254_v12  ;;  %287 = vst [vmem:[%s215_s21 + $0x8] sm:$0xff] %v255_v17  ;;  %p565_p13 = scmp.lt.s32.totalorder %s310_s19, %s563_s12 }
  0x40   : > { %v259_v28 = vand.u32 2147483647, %v251_v20  ;;  %v253_v30 = vsub.f32 %v237_v25, %v245_v26  ;;  %288 = vst [vmem:[%s215_s21 + $0x10] sm:$0xff] %v256_v18  ;;  %p561_p3 = pneg %p560_p0  ;;  %s564_s30 = scalar_lea.vmem %s563_s12, 2048 }
  0x41   : > { %v260_v29 = vand.u32 2147483647, %v252_v24  ;;  %289 = vst [vmem:[%s215_s21 + $0x18] sm:$0xff] %v257_v23  ;;  %290 = vst [vmem:[%s215_s21 + $0x20] sm:$0xff] %v258_v27  ;;  %p566_p5 = scmp.lt.s32.totalorder %s564_s30, %s558_s7 }
  0x42   : > { %v261_v31 = vand.u32 2147483647, %v253_v30  ;;  %291 = vst [vmem:[%s215_s21 + $0x28] sm:$0xff] %v259_v28 }
  0x43   : > { %292 = vst [vmem:[%s215_s21 + $0x30] sm:$0xff] %v260_v29  ;;  %p567_p12 = por %p566_p5, %p565_p13 }
  0x44   : > { %293 = vst [vmem:[%s215_s21 + $0x38] sm:$0xff] %v261_v31 }
  0x45   : > { %p568_p6 = pnand %p567_p12, %p561_p3 }
  0x47   : > { %571 = shalt.err (!%p568_p6)
}
  0x48   : > { %s572_s4 = scalar_lea.hbm %s307_s29, 1024  ;;  %s576_s26 = scalar_lea.hbm %s840_s2, 2048 }
  0x49   : > { %p573_p7 = scmp.ne.s32.totalorder %s307_s29, %s572_s4  ;;  %p577_p4 = scmp.lt.s32.totalorder %s307_s29, %s840_s2 }
  0x4a   : > { %p578_p10 = scmp.lt.s32.totalorder %s576_s26, %s572_s4 }
  0x4b   : > { %p574_p1 = pnand %p573_p7, %p713_p9 }
  0x4c   : > { %p579_p8 = por %p578_p10, %p577_p4 }
  0x4d   : > { %p575_p2 = pneg %p574_p1 }
  0x4f   : > { %p580_p0 = pnand %p579_p8, %p575_p2 }
  0x51   : > { %583 = shalt.err (!%p580_p0)
}
  0x52   : > { %438 = dma.vmem_to_hbm [thread:$0]  (%p713_p9), %s310_s19, 1024, %s307_s29, %s295_s3  }
  0x53 PF: > { %s321_s5 = sand.u32 1, %s622_s9   ;;  %p847_p3 = scmp.ge.s32.totalorder %s642_s14, 2 }
  0x54   : > { %s322_s16 = scalar_lea.sflag [#allocation4], %s321_s5 }
  0x55   : > { %p448_p13 = pnand %p847_p3, %p720_p11 }
  0x57   : > { %p449_p5 = pneg %p448_p13 }
  0x59   : > { %617 = dma.done.wait (%p449_p5), %s322_s16, 1024  }
  0x5a   : > { %619 = vsyncadd (%p449_p5), %s322_s16, 4294966272  ;;  %s21_s14 = sadd.s32 1, %s642_s14   ;;  %s848_s9 = smov %s626_s10 }
  0x5b   : > { %p18_p12 = scmp.ge.s32.totalorder %s21_s14, 4   ;;  %s849_s10 = smov %s630_s11 }
  0x5c   : > { %s850_s11 = smov %s718_s23  ;;  %s851_s12 = smov %s638_s13 }
  0x5d   : > { %s852_s13 = smov %s854_s17  ;;  %20 = sbr.rel (!%p18_p12) target bundleno = 8 (0x8), region = 90 }
  0x62   :  { %327 = vsyncpa [#allocation3], 1 }
  0x63   :  { %329 = vsyncpa [#allocation3 + $0x1], 1 }
  0x64   :  { %330 = vsyncpa [#allocation6], 1 }
  0x65   :  { %332 = vsyncpa [#allocation6 + $0x1], 1 }
  0x66   :  { %333 = vsyncpa [#allocation4], 1 }
  0x67   :  { %335 = vsyncpa [#allocation4 + $0x1], 1 }

</bundles_post_ra>
